<compile_context>
chip_gen: v5e
topology: v5e:2x2
jax: 0.10.0
libtpu: 0.0.40
codegen_flags: <defaults>
</compile_context>

<pallas_src>
import functools

import jax
import jax.numpy as jnp
from jax import lax
from jax.experimental import pallas as pl
from jax.experimental.pallas import tpu as pltpu

# ---------------------------------------------------------------------------
# "config" constants
# ---------------------------------------------------------------------------
BATCH_SIZE = 5          # config.batch_size
SAMPLING_NUM = 5        # config.sampling_num
RANK_LOSS_WEIGHT = 0.1  # config.rank_loss_weight

_LANES = 128


def _round_up(x, m):
    return ((x + m - 1) // m) * m


# ---------------------------------------------------------------------------
# Fused Total_Loss kernel (single packed VMEM input, scalar SMEM output):
#   1) WeightedRankingLoss / WeightMSELoss : sum(weight * (target - pred)^2)
#   2) DiffLoss                            : mean((task_c_n^T @ shared_c_n)^2) * 0.01
#   3) Distill_Rank_Loss_ListWise          : listwise log / reverse-cumsum loss
# ---------------------------------------------------------------------------
def _total_loss_kernel(buf_ref, out_ref, *, n_feat, d_feat, batch_size, k,
                       strong_k, weak_k, feat_row0, pred_row0, rank_loss_weight):
    # ---- 1) Weighted MSE (rows 0..2 of the packed tile; padded weight lanes are 0) ----
    pred = buf_ref[0:1, :]                                   # (1, 128)
    tgt = buf_ref[1:2, :]                                    # (1, 128)
    w = buf_ref[2:3, :]                                      # (1, 128)
    div = tgt - pred
    wmse = jnp.sum(w * div * div)                            # scalar

    # ---- 2) DiffLoss ------------------------------------------------------------------
    task = buf_ref[feat_row0:feat_row0 + n_feat, 0:d_feat]            # (NF, D)
    shared = buf_ref[feat_row0:feat_row0 + n_feat, d_feat:2 * d_feat]  # (NF, D)
    inv_nf = 1.0 / float(n_feat)
    # center along dim 0 (sample axis)
    task = task - jnp.sum(task, axis=0, keepdims=True) * inv_nf
    shared = shared - jnp.sum(shared, axis=0, keepdims=True) * inv_nf
    # F.normalize(p=2, dim=1): rsqrt-multiply, clamp at eps^2 = 1e-24 (eps = 1e-12)
    task = task * lax.rsqrt(jnp.maximum(
        jnp.sum(task * task, axis=1, keepdims=True), 1e-24))
    shared = shared * lax.rsqrt(jnp.maximum(
        jnp.sum(shared * shared, axis=1, keepdims=True), 1e-24))
    # sum((task^T @ shared)^2) == sum((task @ task^T) * (shared @ shared^T));
    # both Grams are rhs-transposed matmuls (MXU-native, no XLU transpose emitted).
    g_t = lax.dot_general(task, task, (((1,), (1,)), ((), ())),
                          preferred_element_type=jnp.float32)          # (NF, NF)
    g_s = lax.dot_general(shared, shared, (((1,), (1,)), ((), ())),
                          preferred_element_type=jnp.float32)          # (NF, NF)
    # mean(corr^2) * 0.01 ; torch.where(cost > 0, cost, 0) is a no-op on a
    # non-negative value, so it is dropped.
    diff = jnp.sum(g_t * g_s) * (0.01 / float(d_feat * d_feat))        # scalar

    # ---- 3) Distill rank loss (listwise) ------------------------------------------------
    # predictions are (B, K), columns pre-ordered strong | weak | no.
    p = buf_ref[pred_row0:pred_row0 + batch_size, 0:k]                 # (B, K)
    strong = p[:, :strong_k]                                           # (B, Ks)
    weak = p[:, strong_k:strong_k + weak_k]                            # (B, Kw)
    no = p[:, strong_k + weak_k:]                                      # (B, Kn)

    # one EUP pass over exactly the columns the reference takes logs of (strong|weak)
    logs = jnp.log(p[:, :strong_k + weak_k])                           # (B, Ks+Kw)
    strong_above = jnp.sum(logs[:, :strong_k], axis=1, keepdims=True)  # (B, 1)
    weak_above = jnp.sum(logs[:, strong_k:], axis=1, keepdims=True)    # (B, 1)
    sb2 = jnp.sum(weak, axis=1, keepdims=True)                         # (B, 1)
    sb3 = jnp.sum(no, axis=1, keepdims=True)                           # (B, 1)

    # reverse cumulative sum terms:  strong.flip(0).cumsum(0) + sb2 + sb3
    csum = sb2 + sb3
    terms = []
    for t in range(strong_k - 1, -1, -1):
        csum = csum + strong[:, t:t + 1]
        terms.append(csum)
    terms_mat = jnp.concatenate(terms, axis=1)                         # (B, Ks)
    # ONE batched log over all reverse-cumsum terms (no serial EUP chain)
    logsum = jnp.sum(jnp.log(terms_mat), axis=1, keepdims=True)        # (B, 1)

    strong_loss = logsum - strong_above
    weak_loss = sb3 - weak_above          # matches reference: sum(no) - sum(log(weak))
    rank = jnp.sum(strong_loss + weak_loss) * rank_loss_weight         # scalar

    # ---- total -> (1,1) SMEM scalar -----------------------------------------------------
    out_ref[0, 0] = wmse + diff + rank


# ---------------------------------------------------------------------------
# helpers (host-side deterministic "parameters" / glue)
# ---------------------------------------------------------------------------
def make_wmse_weight(batch_size, sampling_num):
    """WeightMSELoss weight: [0, S, S-1, ..., 1] per batch, normalized by its sum."""
    w = []
    for _ in range(batch_size):
        w.append(0.0)
        for t in range(sampling_num):
            w.append(float(sampling_num - t))
    w = jnp.asarray(w, dtype=jnp.float32)
    return w / jnp.sum(w)


def correlation_partition(soft_labels, strong_k, weak_k):
    """Descending argsort of the soft labels; columns [0:strong_k] are 'strong',
    [strong_k:strong_k+weak_k] are 'weak', the rest are 'no'."""
    # TODO(synk): `correlation_partition` is not defined in the reference source;
    #             implemented as a deterministic fixed-size top-k partition so
    #             shapes stay static.
    del strong_k, weak_k
    return jnp.argsort(-soft_labels, axis=1)


# ---------------------------------------------------------------------------
# Total_Loss forward (one fused pallas_call, one packed input DMA, SMEM scalar out)
# ---------------------------------------------------------------------------
def total_loss(target_pred, target_distance, soft_labels, predicted_distance,
               specific_representation, invariant_representation,
               *, wmse_weight, batch_size=BATCH_SIZE,
               strong_k=3, weak_k=2, rank_loss_weight=RANK_LOSS_WEIGHT):
    n = wmse_weight.shape[0]
    shared = specific_representation.astype(jnp.float32)    # DiffLoss shared_feats
    task = invariant_representation.astype(jnp.float32)     # DiffLoss task_feats
    n_feat, d_feat = task.shape
    k = predicted_distance.shape[0] // batch_size

    assert n <= _LANES and 2 * d_feat <= _LANES and k <= _LANES

    # rank loss: single gather reorders predictions into strong|weak|no columns
    pred2d = predicted_distance.reshape(batch_size, k).astype(jnp.float32)
    order = correlation_partition(soft_labels, strong_k, weak_k)
    sorted_pred = jnp.take_along_axis(pred2d, order, axis=1)           # (B, K)

    # --- pack everything into ONE lane-dense (rows, 128) f32 tile -------------
    feat_row0 = 8
    pred_row0 = feat_row0 + _round_up(n_feat, 8)
    rows = pred_row0 + _round_up(batch_size, 8)

    buf = jnp.zeros((rows, _LANES), jnp.float32)
    buf = buf.at[0, :n].set(target_pred.reshape(-1).astype(jnp.float32))
    buf = buf.at[1, :n].set(target_distance.reshape(-1).astype(jnp.float32))
    buf = buf.at[2, :n].set(wmse_weight.reshape(-1).astype(jnp.float32))
    buf = buf.at[feat_row0:feat_row0 + n_feat, :d_feat].set(task)
    buf = buf.at[feat_row0:feat_row0 + n_feat, d_feat:2 * d_feat].set(shared)
    buf = buf.at[pred_row0:pred_row0 + batch_size, :k].set(sorted_pred)

    kernel = functools.partial(
        _total_loss_kernel,
        n_feat=int(n_feat), d_feat=int(d_feat),
        batch_size=int(batch_size), k=int(k),
        strong_k=int(strong_k), weak_k=int(weak_k),
        feat_row0=int(feat_row0), pred_row0=int(pred_row0),
        rank_loss_weight=float(rank_loss_weight))

    out = pl.pallas_call(
        kernel,
        out_shape=jax.ShapeDtypeStruct((1, 1), jnp.float32),
        in_specs=[pl.BlockSpec(memory_space=pltpu.MemorySpace.VMEM)],
        out_specs=pl.BlockSpec(memory_space=pltpu.MemorySpace.SMEM),
    )(buf)
    return out[0, 0]


# ---------------------------------------------------------------------------
# main
# ---------------------------------------------------------------------------
if __name__ == "__main__":
    key = jax.random.PRNGKey(0)
    k1, k2, k3, k4, k5, k6 = jax.random.split(key, 6)

    n_pairs = BATCH_SIZE * (1 + SAMPLING_NUM)      # 30
    seq_per_batch = 8
    n_feats, d_feats = 16, 32

    target_pred = jax.random.uniform(k1, (n_pairs,), dtype=jnp.float32)
    target_distance = jax.random.uniform(k2, (n_pairs, 1), dtype=jnp.float32)
    soft_labels = jax.random.uniform(k3, (BATCH_SIZE, seq_per_batch), dtype=jnp.float32)
    # predictions must be strictly positive (log in the rank loss; same as reference)
    predicted_distance = jax.random.uniform(
        k4, (BATCH_SIZE * seq_per_batch,), dtype=jnp.float32, minval=0.1, maxval=1.0)
    specific_representation = jax.random.normal(k5, (n_feats, d_feats), dtype=jnp.float32)
    invariant_representation = jax.random.normal(k6, (n_feats, d_feats), dtype=jnp.float32)

    # deterministic "parameter": WeightMSELoss weight vector [0, 5, 4, 3, 2, 1] * B, normalized
    wmse_weight = make_wmse_weight(BATCH_SIZE, SAMPLING_NUM)

    loss_fn = jax.jit(functools.partial(total_loss, wmse_weight=wmse_weight))
    loss = loss_fn(target_pred, target_distance, soft_labels, predicted_distance,
                   specific_representation, invariant_representation)
    jax.block_until_ready(loss)
    print("KERNEL_OK")
</pallas_src>

<mosaic_0001>
module attributes {stable_mosaic.version = 11 : i64} {
  func.func @_total_loss_kernel(%arg0: memref<32x128xf32, #tpu.memory_space<vmem>>, %arg1: memref<1x1xf32, #tpu.memory_space<smem>>) attributes {dimension_semantics = [], scalar_prefetch = 0 : i64, scratch_operands = 0 : i64, tpu.core_type = #tpu.core_type<tc>} {
    %c0 = arith.constant 0 : index
    %c0_0 = arith.constant 0 : index
    %0 = vector.load %arg0[%c0, %c0_0] : memref<32x128xf32, #tpu.memory_space<vmem>>, vector<1x128xf32>
    %c1 = arith.constant 1 : index
    %c0_1 = arith.constant 0 : index
    %1 = vector.load %arg0[%c1, %c0_1] : memref<32x128xf32, #tpu.memory_space<vmem>>, vector<1x128xf32>
    %c2 = arith.constant 2 : index
    %c0_2 = arith.constant 0 : index
    %2 = vector.load %arg0[%c2, %c0_2] : memref<32x128xf32, #tpu.memory_space<vmem>>, vector<1x128xf32>
    %3 = arith.subf %1, %0 : vector<1x128xf32>
    %4 = arith.mulf %2, %3 : vector<1x128xf32>
    %5 = arith.mulf %4, %3 : vector<1x128xf32>
    %6 = vector.shape_cast %5 : vector<1x128xf32> to vector<1x1x128xf32>
    %cst = arith.constant dense<0.000000e+00> : vector<1xf32>
    %7 = vector.multi_reduction <add>, %6, %cst [1, 2] : vector<1x1x128xf32> to vector<1xf32>
    %8 = vector.shape_cast %7 : vector<1xf32> to vector<1x1x1xf32>
    %9 = vector.extract %8[0, 0, 0] : f32 from vector<1x1x1xf32>
    %c8 = arith.constant 8 : index
    %c0_3 = arith.constant 0 : index
    %10 = vector.load %arg0[%c8, %c0_3] : memref<32x128xf32, #tpu.memory_space<vmem>>, vector<16x32xf32>
    %c8_4 = arith.constant 8 : index
    %c32 = arith.constant 32 : index
    %11 = vector.load %arg0[%c8_4, %c32] : memref<32x128xf32, #tpu.memory_space<vmem>>, vector<16x32xf32>
    %cst_5 = arith.constant dense<0.000000e+00> : vector<32xf32>
    %12 = vector.multi_reduction <add>, %10, %cst_5 [0] : vector<16x32xf32> to vector<32xf32>
    %13 = vector.shape_cast %12 : vector<32xf32> to vector<1x32xf32>
    %cst_6 = arith.constant 6.250000e-02 : f32
    %14 = vector.broadcast %cst_6 : f32 to vector<1x32xf32>
    %15 = arith.mulf %13, %14 : vector<1x32xf32>
    %16 = vector.broadcast %15 : vector<1x32xf32> to vector<16x32xf32>
    %17 = arith.subf %10, %16 : vector<16x32xf32>
    %cst_7 = arith.constant dense<0.000000e+00> : vector<32xf32>
    %18 = vector.multi_reduction <add>, %11, %cst_7 [0] : vector<16x32xf32> to vector<32xf32>
    %19 = vector.shape_cast %18 : vector<32xf32> to vector<1x32xf32>
    %cst_8 = arith.constant 6.250000e-02 : f32
    %20 = vector.broadcast %cst_8 : f32 to vector<1x32xf32>
    %21 = arith.mulf %19, %20 : vector<1x32xf32>
    %22 = vector.broadcast %21 : vector<1x32xf32> to vector<16x32xf32>
    %23 = arith.subf %11, %22 : vector<16x32xf32>
    %24 = arith.mulf %17, %17 : vector<16x32xf32>
    %cst_9 = arith.constant dense<0.000000e+00> : vector<16xf32>
    %25 = vector.multi_reduction <add>, %24, %cst_9 [1] : vector<16x32xf32> to vector<16xf32>
    %26 = vector.shape_cast %25 : vector<16xf32> to vector<16x1xf32>
    %cst_10 = arith.constant 1.000000e-24 : f32
    %27 = vector.broadcast %cst_10 : f32 to vector<16x1xf32>
    %28 = arith.maximumf %26, %27 : vector<16x1xf32>
    %29 = math.rsqrt %28 : vector<16x1xf32>
    %30 = vector.broadcast %29 : vector<16x1xf32> to vector<16x32xf32>
    %31 = arith.mulf %17, %30 : vector<16x32xf32>
    %32 = arith.mulf %23, %23 : vector<16x32xf32>
    %cst_11 = arith.constant dense<0.000000e+00> : vector<16xf32>
    %33 = vector.multi_reduction <add>, %32, %cst_11 [1] : vector<16x32xf32> to vector<16xf32>
    %34 = vector.shape_cast %33 : vector<16xf32> to vector<16x1xf32>
    %cst_12 = arith.constant 1.000000e-24 : f32
    %35 = vector.broadcast %cst_12 : f32 to vector<16x1xf32>
    %36 = arith.maximumf %34, %35 : vector<16x1xf32>
    %37 = math.rsqrt %36 : vector<16x1xf32>
    %38 = vector.broadcast %37 : vector<16x1xf32> to vector<16x32xf32>
    %39 = arith.mulf %23, %38 : vector<16x32xf32>
    %cst_13 = arith.constant dense<0.000000e+00> : vector<16x16xf32>
    %40 = tpu.matmul %31, %31, %cst_13 {dimension_numbers = #tpu.dot_dimension_numbers<[1], [1], [0], [0], [0, 0, 1, 0], [], []>} : vector<16x32xf32>, vector<16x32xf32>, vector<16x16xf32> -> vector<16x16xf32>
    %cst_14 = arith.constant dense<0.000000e+00> : vector<16x16xf32>
    %41 = tpu.matmul %39, %39, %cst_14 {dimension_numbers = #tpu.dot_dimension_numbers<[1], [1], [0], [0], [0, 0, 1, 0], [], []>} : vector<16x32xf32>, vector<16x32xf32>, vector<16x16xf32> -> vector<16x16xf32>
    %42 = arith.mulf %40, %41 : vector<16x16xf32>
    %43 = vector.shape_cast %42 : vector<16x16xf32> to vector<1x16x16xf32>
    %cst_15 = arith.constant dense<0.000000e+00> : vector<1xf32>
    %44 = vector.multi_reduction <add>, %43, %cst_15 [1, 2] : vector<1x16x16xf32> to vector<1xf32>
    %45 = vector.shape_cast %44 : vector<1xf32> to vector<1x1x1xf32>
    %46 = vector.extract %45[0, 0, 0] : f32 from vector<1x1x1xf32>
    %cst_16 = arith.constant 9.76562478E-6 : f32
    %47 = arith.mulf %46, %cst_16 : f32
    %c24 = arith.constant 24 : index
    %c0_17 = arith.constant 0 : index
    %48 = vector.load %arg0[%c24, %c0_17] : memref<32x128xf32, #tpu.memory_space<vmem>>, vector<5x8xf32>
    %49 = vector.extract_strided_slice %48 {offsets = [0, 0], sizes = [5, 3], strides = [1, 1]} : vector<5x8xf32> to vector<5x3xf32>
    %50 = vector.extract_strided_slice %48 {offsets = [0, 3], sizes = [5, 2], strides = [1, 1]} : vector<5x8xf32> to vector<5x2xf32>
    %51 = vector.extract_strided_slice %48 {offsets = [0, 5], sizes = [5, 3], strides = [1, 1]} : vector<5x8xf32> to vector<5x3xf32>
    %52 = vector.extract_strided_slice %48 {offsets = [0, 0], sizes = [5, 5], strides = [1, 1]} : vector<5x8xf32> to vector<5x5xf32>
    %53 = math.log %52 : vector<5x5xf32>
    %54 = vector.extract_strided_slice %53 {offsets = [0, 0], sizes = [5, 3], strides = [1, 1]} : vector<5x5xf32> to vector<5x3xf32>
    %cst_18 = arith.constant dense<0.000000e+00> : vector<5xf32>
    %55 = vector.multi_reduction <add>, %54, %cst_18 [1] : vector<5x3xf32> to vector<5xf32>
    %56 = vector.shape_cast %55 : vector<5xf32> to vector<5x1xf32>
    %57 = vector.extract_strided_slice %53 {offsets = [0, 3], sizes = [5, 2], strides = [1, 1]} : vector<5x5xf32> to vector<5x2xf32>
    %cst_19 = arith.constant dense<0.000000e+00> : vector<5xf32>
    %58 = vector.multi_reduction <add>, %57, %cst_19 [1] : vector<5x2xf32> to vector<5xf32>
    %59 = vector.shape_cast %58 : vector<5xf32> to vector<5x1xf32>
    %cst_20 = arith.constant dense<0.000000e+00> : vector<5xf32>
    %60 = vector.multi_reduction <add>, %50, %cst_20 [1] : vector<5x2xf32> to vector<5xf32>
    %61 = vector.shape_cast %60 : vector<5xf32> to vector<5x1xf32>
    %cst_21 = arith.constant dense<0.000000e+00> : vector<5xf32>
    %62 = vector.multi_reduction <add>, %51, %cst_21 [1] : vector<5x3xf32> to vector<5xf32>
    %63 = vector.shape_cast %62 : vector<5xf32> to vector<5x1xf32>
    %64 = arith.addf %61, %63 : vector<5x1xf32>
    %65 = vector.extract_strided_slice %49 {offsets = [0, 2], sizes = [5, 1], strides = [1, 1]} : vector<5x3xf32> to vector<5x1xf32>
    %66 = arith.addf %64, %65 : vector<5x1xf32>
    %67 = vector.extract_strided_slice %49 {offsets = [0, 1], sizes = [5, 1], strides = [1, 1]} : vector<5x3xf32> to vector<5x1xf32>
    %68 = arith.addf %66, %67 : vector<5x1xf32>
    %69 = vector.extract_strided_slice %49 {offsets = [0, 0], sizes = [5, 1], strides = [1, 1]} : vector<5x3xf32> to vector<5x1xf32>
    %70 = arith.addf %68, %69 : vector<5x1xf32>
    %71 = tpu.concatenate %66, %68, %70 in 1 : vector<5x1xf32>, vector<5x1xf32>, vector<5x1xf32> -> vector<5x3xf32>
    %72 = math.log %71 : vector<5x3xf32>
    %cst_22 = arith.constant dense<0.000000e+00> : vector<5xf32>
    %73 = vector.multi_reduction <add>, %72, %cst_22 [1] : vector<5x3xf32> to vector<5xf32>
    %74 = vector.shape_cast %73 : vector<5xf32> to vector<5x1xf32>
    %75 = arith.subf %74, %56 : vector<5x1xf32>
    %76 = arith.subf %63, %59 : vector<5x1xf32>
    %77 = arith.addf %75, %76 : vector<5x1xf32>
    %78 = vector.shape_cast %77 : vector<5x1xf32> to vector<1x5x1xf32>
    %cst_23 = arith.constant dense<0.000000e+00> : vector<1xf32>
    %79 = vector.multi_reduction <add>, %78, %cst_23 [1, 2] : vector<1x5x1xf32> to vector<1xf32>
    %80 = vector.shape_cast %79 : vector<1xf32> to vector<1x1x1xf32>
    %81 = vector.extract %80[0, 0, 0] : f32 from vector<1x1x1xf32>
    %cst_24 = arith.constant 1.000000e-01 : f32
    %82 = arith.mulf %81, %cst_24 : f32
    %83 = arith.addf %9, %47 : f32
    %84 = arith.addf %83, %82 : f32
    %c0_25 = arith.constant 0 : index
    %c0_26 = arith.constant 0 : index
    %85 = memref.load %arg1[%c0_25, %c0_26] : memref<1x1xf32, #tpu.memory_space<smem>>
    memref.store %84, %arg1[%c0_25, %c0_26] : memref<1x1xf32, #tpu.memory_space<smem>>
    return
  }
}

</mosaic_0001>

<bundles_post_ra>
// kernel: neg.1
= control target key start
LH: loop header
LB: loop body
LE: loop exit
PB: predicated region body
PF: predicated region fallthrough
CT: control target
= control target key end

     0   :  { %s24_s0 = inlined_call_operand.vmem [shape: f32[5,8], index: 0, kind: input, shape index: {}]   ;;  %s25_s1 = inlined_call_operand.vmem [shape: f32[5,8], index: 1, kind: output, shape index: {}]  }
   0x1   :  { %v2_v0 = vld [vmem:[%s24_s0] sm:$0xff] }
   0x2   :  { %v5_v1 = vxor.u32 2147483648, %v2_v0 }
   0x4   :  { %7 = vst [vmem:[%s25_s1] sm:$0xff] %v5_v1 }

// kernel: total_loss.1
= control target key start
LH: loop header
LB: loop body
LE: loop exit
PB: predicated region body
PF: predicated region fallthrough
CT: control target
= control target key end

     0   :  { %vm41_vm0 = vcmask 523520   ;;  %s440_s0 = inlined_call_operand.vmem [shape: f32[32,128], index: 0, kind: input, shape index: {}]   ;;  %s441_s1 = inlined_call_operand.hbm [shape: f32[1,1], index: 1, kind: output, shape index: {}]  }
   0x1   :  { %v26_v0 = vld [vmem:[%s440_s0 + $0x8] sm:$0xff]  ;;  %v27_v1 = vld [vmem:[%s440_s0 + $0x10] sm:$0xff] }
   0x2   :  { %v42_v2 = vsel %vm41_vm0, %v26_v0, 0.0  ;;  %v43_v3 = vsel %vm41_vm0, %v27_v1, 0.0 }
   0x3   :  { %6 = vsyncpa [#allocation3], 0  ;;  %v44_v4 = vadd.f32 %v43_v3, %v42_v2  ;;  %s345_s10 = smov 96   ;;  %vm28_vm1 = vcmask 261120   ;;  %v392_v36 = vld [vmem:[%s440_s0 + $0x18] sm:$0x1f] }
   0x4   :  { %v30_v16 = vsel %vm28_vm1, %v27_v1, 0.0  ;;  %v29_v17 = vsel %vm28_vm1, %v26_v0, 0.0  ;;  %s346_s13 = smov 123   ;;  %s347_s14 = smov 125   ;;  %vm207_vm14 = vcmask 20480   ;;  %vm215_vm15 = vcmask 12288  }
   0x5   :  { %v45_v5 = vrot.slane %v44_v4, 4  ;;  %v31_v18 = vadd.f32 %v30_v16, %v29_v17  ;;  %s348_s15 = smov 1   ;;  %s349_s16 = smov 2   ;;  %vm15_vm0 = vcmask 1040384  }
   0x6   :  { %s350_s17 = smov 126   ;;  %s351_s18 = smov 127  }
   0x7   :  { %v46_v6 = vadd.f32 %v45_v5, %v44_v4  ;;  %v32_v19 = vrot.slane %v31_v18, 4  ;;  %s283_s29 = sshll.u32 %s441_s1, 4  ;;  %s352_s5 = smov [#allocation2]   ;;  %s284_s29 = int_to_ptr.hbm [resolvable:$true] %s283_s29 }
   0x9   :  { %v47_v7 = vrot.slane %v46_v6, 2  ;;  %v33_v20 = vadd.f32 %v32_v19, %v31_v18 }
   0xb   :  { %v48_v8 = vadd.f32 %v47_v7, %v46_v6  ;;  %v34_v21 = vrot.slane %v33_v20, 2 }
   0xd   :  { %v49_v9 = vrot.slane %v48_v8, 1  ;;  %v35_v22 = vadd.f32 %v34_v21, %v33_v20 }
   0xf   :  { %v50_v10 = vadd.f32 %v49_v9, %v48_v8  ;;  %v36_v23 = vrot.slane %v35_v22, 1 }
  0x11   :  { %v51_v11 = vmul.f32 0.0625, %v50_v10  ;;  %v37_v24 = vadd.f32 %v36_v23, %v35_v22 }
  0x13   :  { %v369_v12 = vsub.f32 %v27_v1, %v51_v11  ;;  %v374_v14 = vsub.f32 %v26_v0, %v51_v11  ;;  %v38_v25 = vmul.f32 0.0625, %v37_v24 }
  0x15   :  { %v87_v13 = vmul.f32 %v369_v12, %v369_v12  ;;  %v86_v15 = vmul.f32 %v374_v14, %v374_v14  ;;  %v40_v26 = vsub.f32 %v27_v1, %v38_v25  ;;  %v381_v28 = vsub.f32 %v26_v0, %v38_v25 }
  0x17   :  { %92 = vrot.lane.b32.xlu0 %v87_v13, %s345_s10  ;;  %v55_v27 = vmul.f32 %v40_v26, %v40_v26  ;;  %v54_v31 = vmul.f32 %v381_v28, %v381_v28 }
  0x19   :  { %v59_v29 = vsel %vm28_vm1, %v55_v27, 0.0  ;;  %v56_v33 = vsel %vm28_vm1, %v54_v31, 0.0  ;;  %v11_v31 = vld [vmem:[%s440_s0 + $0x2] sm:$0x1] }
  0x1a   :  { %60 = vadd.xlane.f32.xlu2 %v59_v29  ;;  %v10_v29 = vld [vmem:[%s440_s0 + $0x1] sm:$0x1] }
  0x1f   :  { %90 = vrot.lane.b32.xlu0 %v86_v15, %s345_s10 }
  0x22   :  { %57 = vadd.xlane.f32.xlu2 %v56_v33 }
  0x3a   :  { %226 = vrot.lane.b32.xlu2 %v392_v36, %s346_s13 }
  0x89   :  { %v93_v30 = vpop.permute.xlu0 %92 }
  0x8a   :  { %v99_v32 = vsel %vm28_vm1, %v93_v30, 0.0 }
  0x8b   :  { %100 = vadd.xlane.f32.xlu1 %v99_v32 }
  0x8d   :  { %v61_v37 = vpop.xlane.xlu2 %60 }
  0x8e   :  { %v63_v38 = vmax.f32 %v61_v37, 1e-24 }
  0x90   :  { %319 = vrsqrt.f32 %v63_v38  ;;  %vm80_vm2 = vweird.f32 %v63_v38 }
  0x91   :  { %v91_v34 = vpop.permute.xlu0 %90 }
  0x92   :  { %v96_v35 = vsel %vm28_vm1, %v91_v34, 0.0 }
  0x93   :  { %97 = vadd.xlane.f32.xlu1 %v96_v35 }
  0x95   :  { %v58_v41 = vpop.xlane.xlu2 %57 }
  0x96   :  { %v320_v42 = vpop.eup %319  ;;  %v62_v43 = vmax.f32 %v58_v41, 1e-24 }
  0x97   :  { %v75_v44 = vmul.f32 %v320_v42, %v63_v38  ;;  %vm81_vm3 = vweird.f32 %v320_v42 }
  0x98   :  { %vm82_vm4 = vmor %vm80_vm2, %vm81_vm3  ;;  %vm70_vm8 = vweird.f32 %v62_v43  ;;  %vm252_vm2 = vcmask 15360   ;;  %vm190_vm3 = vcmask 130048  }
  0x99   :  { %v76_v48 = vmul.f32 %v320_v42, %v75_v44 }
  0x9b   :  { %v77_v50 = vmul.f32 0.5, %v76_v48 }
  0x9d   :  { %v78_v52 = vsub.f32 1.5, %v77_v50  ;;  %v227_v13 = vpop.permute.xlu2 %226 }
  0x9e   :  { %v229_v15 = vsel %vm207_vm14, %v227_v13, 0.0 }
  0x9f   :  { %v79_v56 = vmul.f32 %v320_v42, %v78_v52  ;;  %230 = vadd.xlane.f32.xlu2 %v229_v15 }
  0xa1   :  { %v83_v60 = vsel %vm82_vm4, %v320_v42, %v79_v56  ;;  %vm262_vm4 = vcmask 4096  }
  0xa2   :  { %v85_v63 = vmul.f32 %v83_v60, %v40_v26 }
  0xa4   :  { %301 = vmatpush.xpose.msk.msra.mxu2 %vm28_vm1, %v85_v63  ;;  %293 = vmatpush.xpose.msk.msra.mxu0 %vm28_vm1, %v85_v63 }
  0xac   :  { %220 = vrot.lane.b32.xlu1 %v392_v36, %s347_s14 }
  0xb4   :  { %234 = vrot.lane.b32.xlu1 %v392_v36, %s348_s15 }
  0xbc   :  { %238 = vrot.lane.b32.xlu1 %v392_v36, %s349_s16 }
  0xfe   :  { %v101_v39 = vpop.xlane.xlu1 %100 }
  0xff   :  { %v103_v40 = vmax.f32 %v101_v39, 1e-24 }
 0x101   :  { %321 = vrsqrt.f32 %v103_v40  ;;  %vm120_vm6 = vweird.f32 %v103_v40 }
 0x102   :  { %323 = vrsqrt.f32 %v62_v43 }
 0x106   :  { %v98_v45 = vpop.xlane.xlu1 %97 }
 0x107   :  { %v322_v46 = vpop.eup %321  ;;  %v102_v47 = vmax.f32 %v98_v45, 1e-24 }
 0x108   :  { %v115_v49 = vmul.f32 %v322_v46, %v103_v40  ;;  %v324_v53 = vpop.eup %323  ;;  %vm121_vm5 = vweird.f32 %v322_v46 }
 0x109   :  { %325 = vrsqrt.f32 %v102_v47  ;;  %v65_v55 = vmul.f32 %v324_v53, %v62_v43  ;;  %vm122_vm7 = vmor %vm120_vm6, %vm121_vm5  ;;  %vm71_vm9 = vweird.f32 %v324_v53  ;;  %vm110_vm12 = vweird.f32 %v102_v47 }
 0x10a   :  { %v116_v51 = vmul.f32 %v322_v46, %v115_v49  ;;  %vm72_vm10 = vmor %vm70_vm8, %vm71_vm9  ;;  %327 = vlog2.f32 %v392_v36 }
 0x10b   :  { %v66_v59 = vmul.f32 %v324_v53, %v65_v55 }
 0x10c   :  { %v117_v54 = vmul.f32 0.5, %v116_v51 }
 0x10d   :  { %v67_v0 = vmul.f32 0.5, %v66_v59 }
 0x10e   :  { %v118_v57 = vsub.f32 1.5, %v117_v54 }
 0x10f   :  { %v326_v58 = vpop.eup %325  ;;  %v68_v4 = vsub.f32 1.5, %v67_v0 }
 0x110   :  { %v105_v61 = vmul.f32 %v326_v58, %v102_v47  ;;  %v119_v62 = vmul.f32 %v322_v46, %v118_v57  ;;  %vm111_vm11 = vweird.f32 %v326_v58  ;;  %v328_v25 = vpop.eup %327 }
 0x111   :  { %v69_v6 = vmul.f32 %v324_v53, %v68_v4  ;;  %vm112_vm13 = vmor %vm110_vm12, %vm111_vm11  ;;  %v206_v26 = vmul.f32 0.6931472, %v328_v25 }
 0x112   :  { %v106_v1 = vmul.f32 %v326_v58, %v105_v61  ;;  %v123_v2 = vsel %vm122_vm7, %v322_v46, %v119_v62  ;;  %v418_v19 = vpop.xlane.xlu2 %230 }
 0x113   :  { %v125_v3 = vmul.f32 %v123_v2, %v369_v12  ;;  %v73_v8 = vsel %vm72_vm10, %v324_v53, %v69_v6  ;;  %v208_v27 = vsel %vm207_vm14, %v206_v26, 0.0 }
 0x114   :  { %v107_v5 = vmul.f32 0.5, %v106_v1  ;;  %v84_v10 = vmul.f32 %v73_v8, %v381_v28  ;;  %v9_v28 = vld [vmem:[%s440_s0] sm:$0x1] }
 0x115   :  { %159 = vrot.lane.b32.xlu0 %v125_v3, %s345_s10  ;;  %v12_v30 = vsub.f32 %v10_v29, %v9_v28 }
 0x116   :  { %v108_v7 = vsub.f32 1.5, %v107_v5  ;;  %302 = vmatpush.xpose.msk.msra.mxu2 %vm28_vm1, %v84_v10  ;;  %294 = vmatpush.xpose.msk.msra.mxu0 %vm28_vm1, %v84_v10 }
 0x117   :  { %v13_v33 = vmul.f32 %v12_v30, %v11_v31 }
 0x118   :  { %v109_v9 = vmul.f32 %v326_v58, %v108_v7 }
 0x119   :  { %296 = vmatmul.msk.f32.vlgmr.msra.gmra.mxu2 %vm28_vm1, %v85_v63  ;;  %295 = vmatmul.msk.f32.vlgmr.msra.gmra.mxu0 %vm28_vm1, %v84_v10  ;;  %v14_v34 = vmul.f32 %v13_v33, %v12_v30 }
 0x11a   :  { %v113_v11 = vsel %vm112_vm13, %v326_v58, %v109_v9 }
 0x11b   :  { %v124_v12 = vmul.f32 %v113_v11, %v374_v14  ;;  %v16_v35 = vsel %vm15_vm0, %v14_v34, 0.0 }
 0x11d   :  { %157 = vrot.lane.b32.xlu0 %v124_v12, %s345_s10 }
 0x11e   :  { %v221_v16 = vpop.permute.xlu1 %220 }
 0x11f   :  { %v223_v17 = vsel %vm215_vm15, %v221_v16, 0.0 }
 0x126   :  { %v235_v23 = vpop.permute.xlu1 %234 }
 0x12e   :  { %v239_v32 = vpop.permute.xlu1 %238 }
 0x147   :  { %224 = vadd.xlane.f32.xlu0 %v223_v17 }
 0x14f   :  { %209 = vadd.xlane.f32.xlu0 %v208_v27 }
 0x157   :  { %17 = vadd.xlane.f32.xlu0 %v16_v35 }
 0x187   :  { %v160_v18 = vpop.permute.xlu0 %159 }
 0x188   :  { %297 = vmatpush.xpose.msk.msra.mxu1 %vm28_vm1, %v160_v18  ;;  %303 = vmatpush.xpose.msk.msra.mxu3 %vm28_vm1, %v160_v18 }
 0x18f   :  { %v158_v14 = vpop.permute.xlu0 %157 }
 0x190   :  { %298 = vmatpush.xpose.msk.msra.mxu1 %vm28_vm1, %v158_v14  ;;  %304 = vmatpush.xpose.msk.msra.mxu3 %vm28_vm1, %v158_v14 }
 0x193   :  { %299 = vmatmul.msk.f32.vlgmr.msra.gmra.mxu1 %vm28_vm1, %v158_v14  ;;  %300 = vmatmul.msk.f32.vlgmr.msra.gmra.mxu3 %vm28_vm1, %v160_v18  ;;  %vm250_vm1 = vcmask 7168  }
 0x196   :  { %v149_v50 = vpop.f32.mrf.mxu0 }
 0x19c   :  { %v152_v46 = vpop.f32.mrf.mxu2 }
 0x1ba   :  { %v225_v20 = vpop.xlane.xlu0 %224 }
 0x1bb   :  { %v232_v21 = vadd.f32 %v418_v19, %v225_v20 }
 0x1bd   :  { %v233_v22 = vadd.f32 %v232_v21, %v392_v36 }
 0x1bf   :  { %243 = vrot.lane.b32.xlu1 %v233_v22, %s350_s17  ;;  %v237_v24 = vadd.f32 %v235_v23, %v233_v22 }
 0x1c1   :  { %v241_v37 = vadd.f32 %v239_v32, %v237_v24 }
 0x1c2   :  { %v210_v55 = vpop.xlane.xlu0 %209 }
 0x1c7   :  { %247 = vrot.lane.b32.xlu1 %v237_v24, %s351_s18 }
 0x1ca   :  { %v18_v56 = vpop.xlane.xlu0 %17 }
 0x1cb   :  { %v19_v57 = vrot.slane %v18_v56, 4 }
 0x1cd   :  { %v20_v58 = vadd.f32 %v19_v57, %v18_v56 }
 0x1cf   :  { %212 = vrot.lane.b32.xlu1 %v206_v26, %s347_s14  ;;  %v21_v59 = vrot.slane %v20_v58, 2 }
 0x1d1   :  { %v22_v60 = vadd.f32 %v21_v59, %v20_v58 }
 0x1d3   :  { %v23_v61 = vrot.slane %v22_v60, 1 }
 0x1d5   :  { %v24_v62 = vadd.f32 %v23_v61, %v22_v60 }
 0x1d7   :  { %305 = vpush %v24_v62 }
 0x208   :  { %s306_s0 = spop %305 }
 0x210   :  { %v182_v47 = vpop.f32.mrf.mxu1 }
 0x211   :  { %v188_v51 = vmul.f32 %v182_v47, %v149_v50 }
 0x213   :  { %v191_v53 = vsel %vm190_vm3, %v188_v51, 0.0 }
 0x216   :  { %v185_v43 = vpop.f32.mrf.mxu3 }
 0x217   :  { %v189_v48 = vmul.f32 %v185_v43, %v152_v46 }
 0x219   :  { %v192_v52 = vsel %vm190_vm3, %v189_v48, 0.0 }
 0x21a   :  { %v193_v54 = vadd.f32 %v192_v52, %v191_v53 }
 0x231   :  { %v244_v36 = vpop.permute.xlu1 %243 }
 0x239   :  { %v248_v38 = vpop.permute.xlu1 %247 }
 0x23a   :  { %v251_v39 = vsel %vm250_vm1, %v244_v36, %v248_v38 }
 0x23b   :  { %v253_v40 = vsel %vm252_vm2, %v251_v39, %v241_v37 }
 0x23c   :  { %329 = vlog2.f32 %v253_v40 }
 0x241   :  { %v213_v41 = vpop.permute.xlu1 %212 }
 0x242   :  { %v330_v42 = vpop.eup %329  ;;  %v216_v44 = vsel %vm215_vm15, %v213_v41, 0.0 }
 0x243   :  { %217 = vadd.xlane.f32.xlu1 %v216_v44  ;;  %v255_v45 = vmul.f32 0.6931472, %v330_v42 }
 0x245   :  { %v256_v49 = vsel %vm207_vm14, %v255_v45, 0.0 }
 0x246   :  { %257 = vadd.xlane.f32.xlu2 %v256_v49 }
 0x24e   :  { %194 = vadd.xlane.f32.xlu2 %v193_v54 }
 0x2b6   :  { %v218_v63 = vpop.xlane.xlu1 %217 }
 0x2b7   :  { %v260_v1 = vsub.f32 %v418_v19, %v218_v63 }
 0x2b9   :  { %v258_v0 = vpop.xlane.xlu2 %257 }
 0x2ba   :  { %v259_v2 = vsub.f32 %v258_v0, %v210_v55 }
 0x2bc   :  { %v261_v3 = vadd.f32 %v260_v1, %v259_v2 }
 0x2be   :  { %v263_v4 = vsel %vm262_vm4, %v261_v3, 0.0 }
 0x2bf   :  { %264 = vadd.xlane.f32.xlu0 %v263_v4 }
 0x2c1   :  { %v195_v5 = vpop.xlane.xlu2 %194 }
 0x2c2   :  { %v196_v6 = vrot.slane %v195_v5, 4 }
 0x2c4   :  { %v197_v7 = vadd.f32 %v196_v6, %v195_v5 }
 0x2c6   :  { %v198_v8 = vrot.slane %v197_v7, 2 }
 0x2c8   :  { %v199_v9 = vadd.f32 %v198_v8, %v197_v7 }
 0x2ca   :  { %v200_v10 = vrot.slane %v199_v9, 1 }
 0x2cc   :  { %v201_v11 = vadd.f32 %v200_v10, %v199_v9 }
 0x2ce   :  { %307 = vpush %v201_v11 }
 0x2ff   :  { %s308_s25 = spop %307 }
 0x300   :  { %s203_s26 = smul.f32 9.765625e-06, %s308_s25 }
 0x302   :  { %s274_s2 = sadd.f32 %s306_s0, %s203_s26 }
 0x332   :  { %v265_v12 = vpop.xlane.xlu0 %264 }
 0x333   :  { %v266_v13 = vrot.slane %v265_v12, 4 }
 0x335   :  { %v267_v15 = vadd.f32 %v266_v13, %v265_v12 }
 0x337   :  { %v268_v16 = vrot.slane %v267_v15, 2 }
 0x339   :  { %v269_v17 = vadd.f32 %v268_v16, %v267_v15 }
 0x33b   :  { %v270_v18 = vrot.slane %v269_v17, 1 }
 0x33d   :  { %v271_v14 = vadd.f32 %v270_v18, %v269_v17 }
 0x33f   :  { %309 = vpush %v271_v14 }
 0x370   :  { %s310_s30 = spop %309 }
 0x371   :  { %s273_s3 = smul.f32 0.1, %s310_s30 }
 0x373   :  { %s275_s4 = sadd.f32 %s274_s2, %s273_s3 }
 0x375   :  { %277 = sst [smem:[#allocation2]] %s275_s4 }
 0x376   :  { %286 = dma.smem_to_hbm %s352_s5, 16, %s284_s29, [#allocation3]  }
 0x377   :  { %343 = dma.done.wait [#allocation3], 16  }
 0x378   :  { %344 = vsyncadd [#allocation3], 4294967280 }
 0x379   :  { %291 = sfence }
 0x37a   :  { %292 = vsyncpa [#allocation3], 1 }

</bundles_post_ra>
